<compile_context>
chip_gen: v6e
topology: v6e:2x2x1
jax: 0.10.0
libtpu: 0.0.40
codegen_flags: <defaults>
</compile_context>

<pallas_src>
import functools
import math

import numpy as np
import jax
import jax.numpy as jnp
from jax.experimental import pallas as pl
from jax.experimental.pallas import tpu as pltpu

_PREC = jax.lax.Precision.HIGHEST


# --------------------------- kernel ---------------------------
def _recon_kernel(we_ref, wi_ref, xe_ref, xi_ref, o_ref, *, precision):
    # we_ref: (1, V, K_e)   equi projection with polar filter pre-folded (resident per b)
    # wi_ref: (1, V, T_i)   inva projection with polar filter pre-folded (resident per b)
    # xe_ref: (1, K_e, tn)  equi SHC slab for this voxel tile
    # xi_ref: (1, T_i, tn)  inva SHC slab for this voxel tile
    # o_ref : (1, V, tn)    reconstructed signal tile (lane-dense output)
    acc = jnp.dot(we_ref[0], xe_ref[0],
                  preferred_element_type=jnp.float32, precision=precision)
    acc = acc + jnp.dot(wi_ref[0], xi_ref[0],
                        preferred_element_type=jnp.float32, precision=precision)
    o_ref[0] = acc.astype(o_ref.dtype)


def _pick_tile(n, target):
    """Voxel-lane tile: whole axis when it fits, else the largest multiple of
    128 <= target. Pallas handles the ragged last block, so no host padding."""
    target = max(128, (int(target) // 128) * 128)
    if n <= target:
        return n
    return target


# --------------------------- wrapper ---------------------------
def reconstruction_forward(x_equi_shc, x_inva_shc, output_shc_to_signal,
                           polar_filter_equi, polar_filter_inva, *,
                           tn_target=8192, stream_dtype=None, out_dtype=None,
                           precision=_PREC, core_parallel=None):
    """Pallas equivalent of ReconstructionMultiSubject.forward (equi & inva on)."""
    B, T_e, C, X, Y, Z = x_equi_shc.shape
    _, T_i = x_inva_shc.shape[:2]
    _, S, C_out, V = output_shc_to_signal.shape
    L = polar_filter_equi.shape[2]
    N = X * Y * Z
    out_dtype = x_equi_shc.dtype if out_dtype is None else out_dtype

    # ---- fold polar filters into the projection matrices (tiny, plain JAX) ----
    scale = jnp.asarray(
        [math.sqrt(4.0 * math.pi / (4 * l + 1)) for l in range(L)], jnp.float32)
    reps = np.asarray([4 * l + 1 for l in range(L)], np.int64)
    C_f = int(reps.sum())
    f_e = jnp.repeat(polar_filter_equi * scale[None, None, :], reps, axis=2,
                     total_repeat_length=C_f)                       # (T_e, S, C_f)
    n_min = min(C, C_f, C_out)
    f_e = f_e[:, :, :n_min]                                         # (T_e, S, n_min)

    M_e = output_shc_to_signal[:, :, :n_min, :]                     # (B, S, n_min, V)
    # W_e[b, v, t, c] = sum_s f_e[t, s, c] * M_e[b, s, c, v]
    W_e = jnp.einsum('tsc,bscv->bvtc', f_e, M_e, precision=_PREC)
    W_e = W_e.reshape(B, V, T_e * n_min).astype(jnp.float32)        # (B, V, K_e)

    # invariant filter: IsoSHConv with L=1 -> scale sqrt(4*pi), coefficient 0 only
    f_i = math.sqrt(4.0 * math.pi) * polar_filter_inva[:, :, 0]     # (T_i, S)
    M_i = output_shc_to_signal[:, :, 0, :]                          # (B, S, V)
    W_i = jnp.einsum('ts,bsv->bvt', f_i, M_i,
                     precision=_PREC).astype(jnp.float32)           # (B, V, T_i)

    K_e = T_e * n_min

    # Big streamed operands: contiguous reshapes only (no concat / pad copies).
    x_e = x_equi_shc[:, :, :n_min].reshape(B, K_e, N)
    x_i = x_inva_shc[:, :, 0].reshape(B, T_i, N)
    if stream_dtype is not None:
        # NOTE: callers already holding bf16 SHC data avoid this extra cast pass;
        # accumulation stays f32 in the MXU (preferred_element_type below).
        x_e = x_e.astype(stream_dtype)
        x_i = x_i.astype(stream_dtype)

    tn = _pick_tile(N, tn_target)
    n_tiles = pl.cdiv(N, tn)

    # Voxel-tile axis innermost: W_e / W_i blocks stay VMEM-resident across the
    # inner loop, and consecutive x / out tiles are contiguous along N in HBM.
    grid = (B, n_tiles)

    kernel = functools.partial(_recon_kernel, precision=precision)

    def _call(dim_semantics):
        return pl.pallas_call(
            kernel,
            out_shape=jax.ShapeDtypeStruct((B, V, N), out_dtype),
            grid_spec=pltpu.PrefetchScalarGridSpec(
                num_scalar_prefetch=0,
                grid=grid,
                in_specs=[
                    pl.BlockSpec((1, V, K_e), lambda b, j: (b, 0, 0)),
                    pl.BlockSpec((1, V, T_i), lambda b, j: (b, 0, 0)),
                    pl.BlockSpec((1, K_e, tn), lambda b, j: (b, 0, j)),
                    pl.BlockSpec((1, T_i, tn), lambda b, j: (b, 0, j)),
                ],
                out_specs=pl.BlockSpec((1, V, tn), lambda b, j: (b, 0, j)),
            ),
            compiler_params=pltpu.CompilerParams(
                dimension_semantics=dim_semantics),
        )(W_e, W_i, x_e, x_i)

    # v7x: split the large voxel-tile axis across the 2 TensorCores. Plain
    # "parallel" does not change codegen; CORE_PARALLEL does. Auto-detect and
    # fall back safely on any failure (v5e/v6e have a single TC).
    if core_parallel is None:
        try:
            kind = jax.devices()[0].device_kind.lower()
        except Exception:
            kind = ""
        core_parallel = ("v7" in kind) or ("7x" in kind)

    if core_parallel:
        try:
            out = _call(("arbitrary", pltpu.CORE_PARALLEL))
        except Exception:
            out = _call(("parallel", "parallel"))
    else:
        out = _call(("parallel", "parallel"))

    return out.reshape(B, V, X, Y, Z)


# -------- pure-JAX reference mirroring the PyTorch module exactly --------
def _iso_sh_conv(x, polar_filter):
    L = polar_filter.shape[2]
    scale = jnp.asarray(
        [math.sqrt(4.0 * math.pi / (4 * l + 1)) for l in range(L)],
        jnp.float32)[None, None, :]
    reps = np.asarray([4 * l + 1 for l in range(L)], np.int64)
    filt = jnp.repeat(polar_filter * scale, reps, axis=2,
                      total_repeat_length=int(reps.sum()))
    n1 = min(x.shape[2], filt.shape[2])
    return x[:, :, None, :n1] * filt[None, :, :, :n1, None, None, None]


def reference_forward(x_equi, x_inva, out_mat, pf_e, pf_i):
    # equi path
    xc = _iso_sh_conv(x_equi, pf_e)                       # (B,T,S,n1,X,Y,Z)
    n = min(xc.shape[3], out_mat.shape[2])
    B, T = xc.shape[:2]
    xc = xc[:, :, :, :n].reshape(B, T, -1, *xc.shape[4:])
    Mr = out_mat[:, :, :n].reshape(out_mat.shape[0], -1, out_mat.shape[-1])
    eq = jnp.einsum('btoxyz,bov->btvxyz', xc, Mr, precision=_PREC).sum(axis=1)
    # inva path
    xci = _iso_sh_conv(x_inva, pf_i)[:, :, :, 0]          # (B,Ti,S,X,Y,Z)
    inv = jnp.einsum('btoxyz,bov->btvxyz', xci, out_mat[:, :, 0],
                     precision=_PREC).sum(axis=1)
    return eq + inv


if __name__ == "__main__":
    key = jax.random.PRNGKey(0)
    B, T_e, T_i = 2, 2, 1
    L, S = 3, 3
    C_f = sum(4 * l + 1 for l in range(L))    # 15 SH coefficients
    C, C_out, V = C_f, C_f, 16
    X = Y = Z = 8                             # N = 512 voxels

    k1, k2, k3, k4, k5 = jax.random.split(key, 5)
    polar_filter_equi = jax.random.normal(k1, (T_e, S, L), jnp.float32)
    polar_filter_inva = jax.random.normal(k2, (T_i, S, 1), jnp.float32)
    x_equi_shc = jax.random.normal(k3, (B, T_e, C, X, Y, Z), jnp.float32)
    x_inva_shc = jax.random.normal(k4, (B, T_i, 1, X, Y, Z), jnp.float32)
    output_shc_to_signal = jax.random.normal(k5, (B, S, C_out, V), jnp.float32)

    y_ref = reference_forward(x_equi_shc, x_inva_shc, output_shc_to_signal,
                              polar_filter_equi, polar_filter_inva)

    # f32 path (default): tight tolerance.
    y = reconstruction_forward(x_equi_shc, x_inva_shc, output_shc_to_signal,
                               polar_filter_equi, polar_filter_inva)
    y = jax.block_until_ready(y)
    np.testing.assert_allclose(np.asarray(y), np.asarray(y_ref),
                               rtol=1e-4, atol=1e-4)

    # bf16-streamed path (halves x HBM traffic): relaxed tolerance, f32 accum.
    y_bf16 = reconstruction_forward(x_equi_shc, x_inva_shc, output_shc_to_signal,
                                    polar_filter_equi, polar_filter_inva,
                                    stream_dtype=jnp.bfloat16)
    y_bf16 = jax.block_until_ready(y_bf16)
    np.testing.assert_allclose(np.asarray(y_bf16), np.asarray(y_ref),
                               rtol=5e-2, atol=5e-1)

    print("KERNEL_OK")
</pallas_src>

<mosaic_0001>
module attributes {stable_mosaic.version = 11 : i64} {
  func.func @_recon_kernel(%arg0: i32, %arg1: i32, %arg2: memref<1x16x30xf32, #tpu.memory_space<vmem>>, %arg3: memref<1x16x1xf32, #tpu.memory_space<vmem>>, %arg4: memref<1x30x512xf32, #tpu.memory_space<vmem>>, %arg5: memref<1x1x512xf32, #tpu.memory_space<vmem>>, %arg6: memref<1x16x512xf32, #tpu.memory_space<vmem>>) attributes {dimension_semantics = [#tpu.dimension_semantics<parallel>, #tpu.dimension_semantics<parallel>], iteration_bounds = array<i64: 2, 1>, scalar_prefetch = 0 : i64, scratch_operands = 0 : i64, tpu.core_type = #tpu.core_type<tc>, window_params = [{transform_indices = @transform_0, window_bounds = array<i64: 1, 16, 30>}, {transform_indices = @transform_1, window_bounds = array<i64: 1, 16, 1>}, {transform_indices = @transform_2, window_bounds = array<i64: 1, 30, 512>}, {transform_indices = @transform_3, window_bounds = array<i64: 1, 1, 512>}, {transform_indices = @transform_4, window_bounds = array<i64: 1, 16, 512>}]} {
    %c0 = arith.constant 0 : index
    %c0_0 = arith.constant 0 : index
    %c0_1 = arith.constant 0 : index
    %0 = vector.load %arg2[%c0, %c0_0, %c0_1] : memref<1x16x30xf32, #tpu.memory_space<vmem>>, vector<1x16x30xf32>
    %1 = vector.shape_cast %0 : vector<1x16x30xf32> to vector<16x30xf32>
    %c0_2 = arith.constant 0 : index
    %c0_3 = arith.constant 0 : index
    %c0_4 = arith.constant 0 : index
    %2 = vector.load %arg4[%c0_2, %c0_3, %c0_4] : memref<1x30x512xf32, #tpu.memory_space<vmem>>, vector<1x30x512xf32>
    %3 = vector.shape_cast %2 : vector<1x30x512xf32> to vector<30x512xf32>
    %cst = arith.constant dense<0.000000e+00> : vector<16x512xf32>
    %4 = tpu.matmul %1, %3, %cst {dimension_numbers = #tpu.dot_dimension_numbers<[1], [0], [0], [1], [0, 0, 1, 1], [], []>, precision = #tpu.contract_precision<fp32>} : vector<16x30xf32>, vector<30x512xf32>, vector<16x512xf32> -> vector<16x512xf32>
    %c0_5 = arith.constant 0 : index
    %c0_6 = arith.constant 0 : index
    %c0_7 = arith.constant 0 : index
    %5 = vector.load %arg3[%c0_5, %c0_6, %c0_7] : memref<1x16x1xf32, #tpu.memory_space<vmem>>, vector<1x16x1xf32>
    %6 = vector.shape_cast %5 : vector<1x16x1xf32> to vector<16x1xf32>
    %c0_8 = arith.constant 0 : index
    %c0_9 = arith.constant 0 : index
    %c0_10 = arith.constant 0 : index
    %7 = vector.load %arg5[%c0_8, %c0_9, %c0_10] : memref<1x1x512xf32, #tpu.memory_space<vmem>>, vector<1x1x512xf32>
    %8 = vector.shape_cast %7 : vector<1x1x512xf32> to vector<1x512xf32>
    %cst_11 = arith.constant dense<0.000000e+00> : vector<16x512xf32>
    %9 = tpu.matmul %6, %8, %cst_11 {dimension_numbers = #tpu.dot_dimension_numbers<[1], [0], [0], [1], [0, 0, 1, 1], [], []>, precision = #tpu.contract_precision<fp32>} : vector<16x1xf32>, vector<1x512xf32>, vector<16x512xf32> -> vector<16x512xf32>
    %10 = arith.addf %4, %9 : vector<16x512xf32>
    %c0_12 = arith.constant 0 : index
    %c0_13 = arith.constant 0 : index
    %c0_14 = arith.constant 0 : index
    %11 = vector.load %arg6[%c0_12, %c0_13, %c0_14] : memref<1x16x512xf32, #tpu.memory_space<vmem>>, vector<1x16x512xf32>
    %12 = vector.shape_cast %11 : vector<1x16x512xf32> to vector<16x512xf32>
    %13 = vector.shape_cast %10 : vector<16x512xf32> to vector<1x16x512xf32>
    tpu.vector_store %arg6[%c0_12, %c0_13, %c0_14], %13 {strides = array<i32>} : memref<1x16x512xf32, #tpu.memory_space<vmem>>, vector<1x16x512xf32>,
    return
  }
  func.func @transform_0(%arg0: i32, %arg1: i32) -> (i32, i32, i32) {
    %c0_i32 = arith.constant 0 : i32
    %c0_i32_0 = arith.constant 0 : i32
    %c0_i32_1 = arith.constant 0 : i32
    return %arg0, %c0_i32, %c0_i32_0 : i32, i32, i32
  }
  func.func @transform_1(%arg0: i32, %arg1: i32) -> (i32, i32, i32) {
    %c0_i32 = arith.constant 0 : i32
    %c0_i32_0 = arith.constant 0 : i32
    %c0_i32_1 = arith.constant 0 : i32
    return %arg0, %c0_i32, %c0_i32_0 : i32, i32, i32
  }
  func.func @transform_2(%arg0: i32, %arg1: i32) -> (i32, i32, i32) {
    %c0_i32 = arith.constant 0 : i32
    %c0_i32_0 = arith.constant 0 : i32
    return %arg0, %c0_i32, %arg1 : i32, i32, i32
  }
  func.func @transform_3(%arg0: i32, %arg1: i32) -> (i32, i32, i32) {
    %c0_i32 = arith.constant 0 : i32
    %c0_i32_0 = arith.constant 0 : i32
    return %arg0, %c0_i32, %arg1 : i32, i32, i32
  }
  func.func @transform_4(%arg0: i32, %arg1: i32) -> (i32, i32, i32) {
    %c0_i32 = arith.constant 0 : i32
    %c0_i32_0 = arith.constant 0 : i32
    return %arg0, %c0_i32, %arg1 : i32, i32, i32
  }
}

</mosaic_0001>

<bundles_post_ra>
// kernel: tpu_custom_call.1
= control target key start
LH: loop header
LB: loop body
LE: loop exit
PB: predicated region body
PF: predicated region fallthrough
CT: control target
= control target key end

     0   :  { %9 = vsyncpa [#allocation3], 0  ;;  %s3601_s0 = inlined_call_operand.vmem [shape: f32[2,16,30], index: 0, kind: input, shape index: {}]   ;;  %s3602_s1 = inlined_call_operand.vmem [shape: f32[2,16,1], index: 1, kind: input, shape index: {}]   ;;  %s3603_s2 = inlined_call_operand.vmem [shape: f32[2,30,512], index: 2, kind: input, shape index: {}]   ;;  %s3604_s3 = inlined_call_operand.vmem [shape: f32[2,1,512], index: 3, kind: input, shape index: {}]   ;;  %s3605_s4 = inlined_call_operand.hbm [shape: f32[2,16,512], index: 4, kind: output, shape index: {}]  }
   0x1   :  { %11 = vsyncpa [#allocation3 + $0x1], 0  ;;  %s2915_s15 = smov 0   ;;  %s2917_s16 = smov 0  }
   0x2   :  { %s2919_s17 = smov 0   ;;  %s2921_s18 = smov 0  }
   0x3   :  { %s2923_s19 = smov 0   ;;  %s2925_s20 = smov 0  }
   0x4 LB: > { %s2728_s21 = sadd.s32 4294967295, %s2884_s20   ;;  %s2729_s22 = sadd.s32 4294967294, %s2884_s20   ;;  %s2884_s20 = sphi %s2925_s20, %s17_s20   ;;  %s2880_s19 = sphi %s2923_s19, %s3628_s19   ;;  %s2876_s18 = sphi %s2921_s18, %s3627_s18   ;;  %s2872_s17 = sphi %s2919_s17, %s3626_s17   ;;  %s2868_s16 = sphi %s2917_s16, %s3625_s16   ;;  %s2864_s15 = sphi %s2915_s15, %s3624_s15  }
   0x5   : > { %s29_s23 = sadd.s32 1, %s2880_s19  ;;  %s146_s24 = sadd.s32 1, %s2872_s17 }
   0x6   : > { %p31_p0 = scmp.ge.s32.totalorder %s29_s23, 2  ;;  %p156_p1 = scmp.ne.s32.totalorder %s2872_s17, %s2868_s16 }
   0x7   : > { %p157_p2 = scmp.eq.s32.totalorder %s2728_s21, 1  ;;  %p162_p3 = scmp.ne.s32.totalorder %s2868_s16, %s2864_s15 }
   0x8   : > { %s3630_s23 = smov (%p31_p0, %s29_s23), 0  ;;  %p163_p5 = scmp.eq.s32.totalorder %s2729_s22, 1 }
   0x9   : > { %p2955_p4 = por %p157_p2, %p156_p1  ;;  %s141_s26 = ssub.s32 %s2880_s19, %s3630_s23 }
   0xa   : > { %p2732_p6 = scmp.ge.s32.totalorder %s2884_s20, 1  ;;  %p144_p7 = scmp.eq.s32.totalorder %s141_s26, 0 }
   0xb   : > { %p2962_p8 = por %p163_p5, %p162_p3  ;;  %p222_p9 = scmp.lt.s32.totalorder %s2884_s20, 3 }
   0xc   : > { %s2968_s28 = scalar_select %p144_p7, %s2872_s17, %s146_s24  }
   0xd   : > { %p223_p10 = pnand %p2732_p6, %p222_p9 }
   0xf   : > { %226 = sbr.rel (%p223_p10) target bundleno = 368 (0x170), region = 36 }
  0x14   : > { %p270_p11 = scmp.lt.s32.totalorder %s2876_s18, 1  ;;  %v322_v0 = vlaneseq  ;;  %v2886_v1 = vmov 0.0   ;;  %vm345_vm0 = vcmask 1040384   ;;  %vm338_vm1 = vcmask 7168   ;;  %s2749_s6 = sshll.u32 %s2876_s18, 10 }
  0x15   : > { %420 = vmatprep.mubr.f32.mxu0 %v2886_v1  ;;  %517 = vmatprep.mubr.f32.mxu1 %v2886_v1  ;;  %vm1389_vm2 = vcmask 1045504   ;;  %vm1382_vm3 = vcmask 244736   ;;  %s3548_s10 = scalar_lea.hbm %s3605_s4, %s2749_s6 }
  0x16   : > { %s2974_s29 = scalar_select %p270_p11, %s2876_s18, 1  ;;  %v323_v2 = vshrl.u32 %v322_v0, 7 }
  0x18   : > { %s2740_s30 = sshll.u32 %s2974_s29, 2  ;;  %v328_v3 = vsub.s32 1, %v323_v2  ;;  %v324_v4 = vsub.s32 0, %v323_v2  ;;  %v336_v5 = vsub.s32 3, %v323_v2  ;;  %s2746_s8 = sshll.u32 %s2974_s29, 4  ;;  %v332_v10 = vsub.s32 2, %v323_v2 }
  0x19   : > { %s297_s7 = scalar_lea.vmem %s3604_s3, %s2740_s30  ;;  %s279_s11 = scalar_lea.vmem %s3602_s1, %s2746_s8 }
  0x1a   : > { %v320_v6 = vld [vmem:[%s297_s7] sm:$0xf]  ;;  %v319_v12 = vld [vmem:[%s279_s11 + $0x8] sm:$0xff]  ;;  %s2748_s12 = sshll.u32 %s2974_s29, 7  ;;  %s3070_s26 = scalar_lea.vmem %s3601_s0, %s2746_s8 }
  0x1b   : > { %v329_v7 = vrot.slane %v320_v6, %v328_v3  ;;  %v325_v8 = vrot.slane %v320_v6, %v324_v4  ;;  %v337_v9 = vrot.slane %v320_v6, %v336_v5  ;;  %v318_v11 = vld [vmem:[%s279_s11] sm:$0xff]  ;;  %v343_v19 = vsel %vm338_vm1, %v319_v12, 0  ;;  %s3039_s21 = scalar_lea.vmem %s3603_s2, %s2748_s12  ;;  %s267_s29 = sand.u32 1, %s2868_s16  }
  0x1c   : > { %v340_v15 = vsel %vm338_vm1, %v318_v11, 0  ;;  %v333_v21 = vrot.slane %v320_v6, %v332_v10  ;;  %v2994_v25 = vand.u32 4294901760, %v343_v19  ;;  %v315_v48 = vld [vmem:[%s3039_s21 + $0x68] sm:$0x3f]  ;;  %v314_v53 = vld [vmem:[%s3039_s21 + $0x60] sm:$0x3f] }
  0x1d   : > { %v348_v13 = vsel %vm345_vm0, %v329_v7, 0  ;;  %v346_v14 = vsel %vm345_vm0, %v325_v8, 0  ;;  %v2988_v18 = vand.u32 4294901760, %v340_v15  ;;  %v352_v20 = vsel %vm345_vm0, %v337_v9, 0  ;;  %v300_v56 = vld [vmem:[%s3070_s26] sm:$0xff]  ;;  %v311_v57 = vld [vmem:[%s3039_s21 + $0x48] sm:$0xff] }
  0x1e   : > { %v384_v16 = vand.u32 4294901760, %v348_v13  ;;  %v386_v17 = vand.u32 4294901760, %v346_v14  ;;  %v2996_v26 = vand.u32 4294901760, %v352_v20  ;;  %v3002_v30 = vsub.f32 %v343_v19, %v2994_v25  ;;  %v310_v62 = vld [vmem:[%s3039_s21 + $0x40] sm:$0xff]  ;;  %v307_v63 = vld [vmem:[%s3039_s21 + $0x28] sm:$0xff]  ;;  %s2733_s30 = sshll.u32 %s267_s29, 6 }
  0x1f   : > { %v2992_v22 = vsub.f32 %v340_v15, %v2988_v18  ;;  %v350_v31 = vsel %vm345_vm0, %v333_v21, 0  ;;  %v1394_v50 = vsel %vm1389_vm2, %v315_v48, 0  ;;  %v1391_v54 = vsel %vm1389_vm2, %v314_v53, 0  ;;  %v306_v2 = vld [vmem:[%s3039_s21 + $0x20] sm:$0xff]  ;;  %v303_v6 = vld [vmem:[%s3039_s21 + $0x8] sm:$0xff]  ;;  %s3511_s5 = scalar_lea.vmem [#allocation2], %s2733_s30 }
  0x20   : > { %385 = vmatprep.subr.mxu0 %v384_v16  ;;  %v474_v23 = vsub.f32 %v348_v13, %v384_v16  ;;  %v480_v24 = vsub.f32 %v346_v14, %v386_v17  ;;  %v3006_v32 = vsub.f32 %v352_v20, %v2996_v26  ;;  %v3011_v36 = vand.u32 4294901760, %v3002_v30  ;;  %v301_v9 = vld [vmem:[%s3070_s26 + $0x8] sm:$0xff]  ;;  %v302_v11 = vld [vmem:[%s3039_s21] sm:$0xff]  ;;  %v316_v53 = vld [vmem:[%s3039_s21 + $0x70] sm:$0x3f]  ;;  %s2610_s7 = sshll.u32 %s3511_s5, 4  ;;  %s3550_s7 = int_to_ptr.vmem [resolvable:$true] %s2610_s7 }
  0x21   : > { %387 = vmatpush1.msra.mxu0 %v386_v17  ;;  %v2999_v27 = vand.u32 4294901760, %v2992_v22  ;;  %v3017_v41 = vand.u32 4294901760, %v350_v31  ;;  %v3058_v52 = vand.u32 4294901760, %v1394_v50  ;;  %v3084_v58 = vand.u32 4294901760, %v1391_v54  ;;  %s3556_s18 = scalar_lea.sflag [#allocation3], %s267_s29  ;;  %s2808_s11 = scalar_lea.vmem %s3550_s7, 1024 }
  0x22   : > { %v475_v28 = vand.u32 4294901760, %v474_v23  ;;  %564 = vmatprep.subr.mxu0 %v474_v23  ;;  %v481_v29 = vand.u32 4294901760, %v480_v24  ;;  %v435_v40 = vsub.f32 %v3002_v30, %v3011_v36  ;;  %v989_v43 = vand.u32 4294901760, %v3006_v32  ;;  %p2809_p12 = scmp.ne.s32.totalorder %s3550_s7, %s2808_s11  ;;  %s2887_s12 = smov [#allocation2]  }
  0x23   : > { %v424_v33 = vsub.f32 %v2992_v22, %v2999_v27  ;;  %v3027_v44 = vsub.f32 %v350_v31, %v3017_v41  ;;  %v3077_v55 = vsub.f32 %v1394_v50, %v3058_v52  ;;  %v1384_v60 = vsel %vm1382_vm3, %v300_v56, 0  ;;  %s2812_s13 = sshll.u32 %s2887_s12, 4  ;;  %s2813_s13 = int_to_ptr.vmem [resolvable:$false] %s2812_s13 }
  0x24   : > { %v476_v34 = vsub.f32 %v474_v23, %v475_v28  ;;  %v482_v35 = vsub.f32 %v480_v24, %v481_v29  ;;  %v3020_v42 = vand.u32 4294901760, %v435_v40  ;;  %v990_v45 = vsub.f32 %v3006_v32, %v989_v43  ;;  %p2810_p13 = pnand %p2809_p12, %p2955_p4  ;;  %s2814_s14 = scalar_lea.vmem %s2813_s13, 2048 }
  0x25   : > { %v3013_v37 = vand.u32 4294901760, %v424_v33  ;;  %v995_v46 = vand.u32 4294901760, %v3027_v44  ;;  %v1523_v59 = vand.u32 4294901760, %v3077_v55  ;;  %v3091_v61 = vand.u32 4294901760, %v311_v57  ;;  %p2815_p1 = scmp.lt.s32.totalorder %s3550_s7, %s2813_s13  ;;  %p2816_p2 = scmp.lt.s32.totalorder %s2814_s14, %s2808_s11 }
  0x26   : > { %v477_v38 = vand.u32 4294901760, %v476_v34  ;;  %v483_v39 = vand.u32 4294901760, %v482_v35  ;;  %v991_v47 = vand.u32 4294901760, %v990_v45  ;;  %v3101_v0 = vsub.f32 %v1391_v54, %v3084_v58  ;;  %p2811_p0 = pneg %p2810_p13 }
  0x27   : > { %426 = vmatmul.mubr.f32.vlgmr.msra.gmra.mxu0 %v3013_v37  ;;  %v996_v49 = vsub.f32 %v3027_v44, %v995_v46  ;;  %v3104_v3 = vand.u32 4294901760, %v1384_v60  ;;  %v3108_v4 = vand.u32 4294901760, %v310_v62  ;;  %v1524_v5 = vsub.f32 %v3077_v55, %v1523_v59  ;;  %p2817_p3 = por %p2816_p2, %p2815_p1 }
  0x28   : > { %478 = vmatprep.subr.mxu1 %v477_v38  ;;  %431 = vmatprep.mubr.f32.mxu0 %v2886_v1  ;;  %v3115_v7 = vand.u32 4294901760, %v307_v63  ;;  %v3118_v8 = vsub.f32 %v311_v57, %v3091_v61  ;;  %v3122_v10 = vand.u32 4294901760, %v306_v2  ;;  %v1529_v12 = vand.u32 4294901760, %v3101_v0  ;;  %v313_v57 = vld [vmem:[%s3039_s21 + $0x58] sm:$0xff] }
  0x29   : > { %484 = vmatpush1.msra.mxu1 %v483_v39  ;;  %567 = vmatpush1.msra.mxu0 %v480_v24  ;;  %v997_v51 = vand.u32 4294901760, %v996_v49  ;;  %v3127_v13 = vand.u32 4294901760, %v303_v6  ;;  %v3131_v14 = vsub.f32 %v310_v62, %v3108_v4  ;;  %v1525_v15 = vand.u32 4294901760, %v1524_v5  ;;  %v309_v5 = vld [vmem:[%s3039_s21 + $0x38] sm:$0xff]  ;;  %p2818_p5 = pnand %p2817_p3, %p2811_p0 }
  0x2a   : > { %519 = vmatmul.mubr.f32.vlgmr.msra.gmra.mxu1 %v2988_v18  ;;  %648 = vmatprep.subr.mxu1 %v384_v16  ;;  %v1535_v19 = vand.u32 4294901760, %v3118_v8  ;;  %v3141_v20 = vand.u32 4294901760, %v302_v11  ;;  %v3144_v21 = vsub.f32 %v307_v63, %v3115_v7  ;;  %v1530_v23 = vsub.f32 %v3101_v0, %v1529_v12  ;;  %v312_v63 = vld [vmem:[%s3039_s21 + $0x50] sm:$0xff] }
  0x2b   : > { %524 = vmatprep.mubr.f32.mxu1 %v2886_v1  ;;  %437 = vmatmul.mubr.f32.gmra.mxu0 %v3020_v42  ;;  %v3157_v24 = vsub.f32 %v303_v6, %v3127_v13  ;;  %v1397_v56 = vsel %vm1389_vm2, %v316_v53, 0  ;;  %v308_v6 = vld [vmem:[%s3039_s21 + $0x30] sm:$0xff] }
  0x2c   : > { %650 = vmatpush1.msra.mxu1 %v386_v17  ;;  %600 = vmatprep.mubr.f32.mxu0 %v2886_v1  ;;  %v3171_v31 = vsub.f32 %v302_v11, %v3141_v20  ;;  %v1531_v33 = vand.u32 4294901760, %v1530_v23  ;;  %v3251_v62 = vand.u32 4294901760, %v1397_v56  ;;  %v3278_v11 = vand.u32 4294901760, %v309_v5 }
  0x2d   : > { %735 = vmatprep.subr.mxu0 %v475_v28  ;;  %818 = vmatprep.subr.mxu1 %v384_v16  ;;  %v3134_v16 = vsub.f32 %v1384_v60, %v3104_v3  ;;  %v1559_v34 = vand.u32 4294901760, %v3157_v24 }
  0x2e   : > { %526 = vmatmul.mubr.f32.gmra.mxu1 %v2994_v25  ;;  %v1565_v40 = vand.u32 4294901760, %v3171_v31 }
  0x2f   : > { %683 = vmatprep.mubr.f32.mxu1 %v2886_v1  ;;  %603 = vmatmul.mubr.f32.vlgmr.msra.gmra.mxu0 %v2992_v22  ;;  %v3164_v28 = vand.u32 4294901760, %v3134_v16 }
  0x30   : > { %608 = vmatprep.mubr.f32.mxu0 %v2886_v1  ;;  %739 = vmatpush1.msra.mxu0 %v481_v29  ;;  %v1536_v29 = vsub.f32 %v3118_v8, %v1535_v19 }
  0x31   : > { %899 = vmatprep.subr.mxu0 %v2996_v26  ;;  %v1478_v38 = vsub.f32 %v3134_v16, %v3164_v28 }
  0x32   : > { %687 = vmatmul.mubr.f32.vlgmr.msra.gmra.mxu1 %v2999_v27 }
  0x33   : > { %820 = vmatpush1.msra.mxu1 %v386_v17  ;;  %692 = vmatprep.mubr.f32.mxu1 %v2886_v1  ;;  %v1387_v17 = vsel %vm1382_vm3, %v301_v9, 0  ;;  %v3267_v9 = vand.u32 4294901760, %v312_v63 }
  0x34   : > { %611 = vmatmul.mubr.f32.gmra.mxu0 %v3002_v30  ;;  %992 = vmatprep.subr.mxu1 %v991_v47 }
  0x35   : > { %772 = vmatprep.mubr.f32.mxu0 %v2886_v1 }
  0x36   : > { %696 = vmatmul.mubr.f32.gmra.mxu1 %v3011_v36 }
  0x37   : > { %853 = vmatprep.mubr.f32.mxu1 %v2886_v1 }
  0x38   : > { %774 = vmatmul.mubr.f32.vlgmr.msra.gmra.mxu0 %v2988_v18 }
  0x39   : > { %779 = vmatprep.mubr.f32.mxu0 %v2886_v1  ;;  %901 = vmatpush1.msra.mxu0 %v3017_v41 }
  0x3a   : > { %855 = vmatmul.mubr.f32.vlgmr.msra.gmra.mxu1 %v2988_v18  ;;  %1078 = vmatprep.subr.mxu0 %v3006_v32  ;;  %v1547_v32 = vand.u32 4294901760, %v3144_v21 }
  0x3b   : > { %998 = vmatpush1.msra.mxu1 %v997_v51  ;;  %860 = vmatprep.mubr.f32.mxu1 %v2886_v1 }
  0x3c   : > { %781 = vmatmul.mubr.f32.gmra.mxu0 %v2994_v25  ;;  %1162 = vmatprep.subr.mxu1 %v2996_v26  ;;  %v1548_v39 = vsub.f32 %v3144_v21, %v1547_v32 }
  0x3d   : > { %934 = vmatprep.mubr.f32.mxu0 %v2886_v1 }
  0x3e   : > { %862 = vmatmul.mubr.f32.gmra.mxu1 %v2994_v25  ;;  %v1549_v45 = vand.u32 4294901760, %v1548_v39 }
  0x3f   : > { %1031 = vmatprep.mubr.f32.mxu1 %v2886_v1 }
  0x40   : > { %940 = vmatmul.mubr.f32.vlgmr.msra.gmra.mxu0 %v3013_v37 }
  0x41   : > { %945 = vmatprep.mubr.f32.mxu0 %v2886_v1  ;;  %1081 = vmatpush1.msra.mxu0 %v3027_v44 }
  0x42   : > { %1033 = vmatmul.mubr.f32.vlgmr.msra.gmra.mxu1 %v2988_v18  ;;  %1249 = vmatprep.subr.mxu0 %v989_v43 }
  0x43   : > { %1164 = vmatpush1.msra.mxu1 %v3017_v41  ;;  %1038 = vmatprep.mubr.f32.mxu1 %v2886_v1 }
  0x44   : > { %951 = vmatmul.mubr.f32.gmra.mxu0 %v3020_v42  ;;  %1332 = vmatprep.subr.mxu1 %v2996_v26  ;;  %v3159_v26 = vand.u32 4294901760, %v1387_v17  ;;  %v1560_v42 = vsub.f32 %v3157_v24, %v1559_v34 }
  0x45   : > { %1114 = vmatprep.mubr.f32.mxu0 %v2886_v1 }
  0x46   : > { %1040 = vmatmul.mubr.f32.gmra.mxu1 %v2994_v25  ;;  %v3179_v35 = vsub.f32 %v1387_v17, %v3159_v26  ;;  %v1561_v48 = vand.u32 4294901760, %v1560_v42 }
  0x47   : > { %1197 = vmatprep.mubr.f32.mxu1 %v2886_v1 }
  0x48   : > { %1117 = vmatmul.mubr.f32.vlgmr.msra.gmra.mxu0 %v2992_v22  ;;  %v3149_v22 = vsub.f32 %v306_v2, %v3122_v10  ;;  %v3203_v43 = vand.u32 4294901760, %v3179_v35  ;;  %v3257_v2 = vand.u32 4294901760, %v313_v57 }
  0x49   : > { %1122 = vmatprep.mubr.f32.mxu0 %v2886_v1  ;;  %1253 = vmatpush1.msra.mxu0 %v995_v46  ;;  %v1566_v46 = vsub.f32 %v3171_v31, %v1565_v40 }
  0x4a   : > { %1201 = vmatmul.mubr.f32.vlgmr.msra.gmra.mxu1 %v2999_v27  ;;  %1427 = vmatprep.subr.mxu0 %v3058_v52  ;;  %v1541_v27 = vand.u32 4294901760, %v3131_v14  ;;  %v1489_v49 = vsub.f32 %v3179_v35, %v3203_v43 }
  0x4b   : > { %1334 = vmatpush1.msra.mxu1 %v3017_v41  ;;  %1206 = vmatprep.mubr.f32.mxu1 %v2886_v1  ;;  %v1567_v50 = vand.u32 4294901760, %v1566_v46 }
  0x4c   : > { %1125 = vmatmul.mubr.f32.gmra.mxu0 %v3002_v30  ;;  %1526 = vmatprep.subr.mxu1 %v1525_v15  ;;  %v1553_v30 = vand.u32 4294901760, %v3149_v22  ;;  %v1542_v37 = vsub.f32 %v3131_v14, %v1541_v27  ;;  %v3223_v51 = vand.u32 4294901760, %v1489_v49  ;;  %v304_v15 = vld [vmem:[%s3039_s21 + $0x10] sm:$0xff] }
  0x4d   : > { %1286 = vmatprep.mubr.f32.mxu0 %v2886_v1  ;;  %v3305_v23 = vand.u32 4294901760, %v304_v15 }
  0x4e   : > { %1210 = vmatmul.mubr.f32.gmra.mxu1 %v3011_v36  ;;  %v1537_v36 = vand.u32 4294901760, %v1536_v29  ;;  %v1554_v41 = vsub.f32 %v3149_v22, %v1553_v30  ;;  %v1543_v44 = vand.u32 4294901760, %v1542_v37 }
  0x4f   : > { %1367 = vmatprep.mubr.f32.mxu1 %v2886_v1 }
  0x50   : > { %1288 = vmatmul.mubr.f32.vlgmr.msra.gmra.mxu0 %v2988_v18  ;;  %v1555_v47 = vand.u32 4294901760, %v1554_v41 }
  0x51   : > { %1429 = vmatpush1.msra.mxu0 %v3084_v58  ;;  %1293 = vmatprep.mubr.f32.mxu0 %v2886_v1 }
  0x52   : > { %1431 = vmatprep.subr.mxu0 %v3091_v61  ;;  %1369 = vmatmul.mubr.f32.vlgmr.msra.gmra.mxu1 %v2988_v18  ;;  %v3207_v18 = vand.u32 4294901760, %v1478_v38 }
  0x53   : > { %1433 = vmatpush1.msra.mxu0 %v3108_v4  ;;  %1532 = vmatpush1.msra.mxu1 %v1531_v33 }
  0x54   : > { %1295 = vmatmul.mubr.f32.gmra.mxu0 %v2994_v25  ;;  %1435 = vmatprep.subr.mxu0 %v3115_v7 }
  0x55   : > { %1437 = vmatpush1.msra.mxu0 %v3122_v10  ;;  %1538 = vmatprep.subr.mxu1 %v1537_v36 }
  0x56   : > { %1439 = vmatprep.subr.mxu0 %v3127_v13  ;;  %1374 = vmatprep.mubr.f32.mxu1 %v2886_v1 }
  0x57   : > { %1441 = vmatpush1.msra.mxu0 %v3141_v20  ;;  %1474 = vmatprep.mubr.f32.mxu0 %v2886_v1 }
  0x58   : > { %1544 = vmatpush1.msra.mxu1 %v1543_v44  ;;  %1480 = vmatmul.mubr.f32.vlgmr.msra.gmra.mxu0 %v3207_v18 }
  0x59   : > { %1376 = vmatmul.mubr.f32.gmra.mxu1 %v2994_v25  ;;  %1550 = vmatprep.subr.mxu1 %v1549_v45  ;;  %v317_v25 = vld [vmem:[%s3039_s21 + $0x78] sm:$0x3f] }
  0x5a   : > { %1642 = vmatprep.subr.mxu0 %v3077_v55  ;;  %1556 = vmatpush1.msra.mxu1 %v1555_v47  ;;  %v1400_v54 = vsel %vm1389_vm2, %v317_v25, 0 }
  0x5b   : > { %1645 = vmatpush1.msra.mxu0 %v3101_v0  ;;  %1562 = vmatprep.subr.mxu1 %v1561_v48  ;;  %v3247_v60 = vand.u32 4294901760, %v1400_v54  ;;  %v3276_v0 = vsub.f32 %v1397_v56, %v3251_v62 }
  0x5c   : > { %1648 = vmatprep.subr.mxu0 %v3118_v8  ;;  %1485 = vmatprep.mubr.f32.mxu0 %v2886_v1  ;;  %v3283_v8 = vand.u32 4294901760, %v308_v6 }
  0x5d   : > { %1568 = vmatpush1.msra.mxu1 %v1567_v50  ;;  %1601 = vmatprep.mubr.f32.mxu1 %v2886_v1  ;;  %v3270_v55 = vsub.f32 %v1400_v54, %v3247_v60 }
  0x5e   : > { %1651 = vmatpush1.msra.mxu0 %v3131_v14  ;;  %1603 = vmatmul.mubr.f32.vlgmr.msra.gmra.mxu1 %v3104_v3  ;;  %v3298_v14 = vsub.f32 %v312_v63, %v3267_v9 }
  0x5f   : > { %1491 = vmatmul.mubr.f32.gmra.mxu0 %v3223_v51  ;;  %1654 = vmatprep.subr.mxu0 %v3144_v21  ;;  %v2121_v21 = vand.u32 4294901760, %v3276_v0 }
  0x60   : > { %1738 = vmatprep.subr.mxu1 %v3058_v52  ;;  %1657 = vmatpush1.msra.mxu0 %v3149_v22 }
  0x61   : > { %1740 = vmatpush1.msra.mxu1 %v3084_v58  ;;  %1660 = vmatprep.subr.mxu0 %v3157_v24  ;;  %v2133_v24 = vand.u32 4294901760, %v3298_v14  ;;  %v2122_v29 = vsub.f32 %v3276_v0, %v2121_v21 }
  0x62   : > { %1742 = vmatprep.subr.mxu1 %v3091_v61  ;;  %1608 = vmatprep.mubr.f32.mxu1 %v2886_v1 }
  0x63   : > { %1663 = vmatpush1.msra.mxu0 %v3171_v31  ;;  %1696 = vmatprep.mubr.f32.mxu0 %v2886_v1  ;;  %v3334_v31 = vsub.f32 %v304_v15, %v3305_v23 }
  0x64   : > { %1744 = vmatpush1.msra.mxu1 %v3108_v4  ;;  %1699 = vmatmul.mubr.f32.vlgmr.msra.gmra.mxu0 %v3134_v16 }
  0x65   : > { %1610 = vmatmul.mubr.f32.gmra.mxu1 %v3159_v26  ;;  %1746 = vmatprep.subr.mxu1 %v3115_v7  ;;  %v2157_v37 = vand.u32 4294901760, %v3334_v31 }
  0x66   : > { %1831 = vmatprep.subr.mxu0 %v1523_v59  ;;  %1748 = vmatpush1.msra.mxu1 %v3122_v10  ;;  %v305_v59 = vld [vmem:[%s3039_s21 + $0x18] sm:$0xff] }
  0x67   : > { %1835 = vmatpush1.msra.mxu0 %v1529_v12  ;;  %1750 = vmatprep.subr.mxu1 %v3127_v13  ;;  %v3286_v12 = vsub.f32 %v313_v57, %v3257_v2  ;;  %v3292_v17 = vand.u32 4294901760, %v305_v59  ;;  %v2158_v41 = vsub.f32 %v3334_v31, %v2157_v37 }
  0x68   : > { %1839 = vmatprep.subr.mxu0 %v1535_v19  ;;  %1704 = vmatprep.mubr.f32.mxu0 %v2886_v1  ;;  %v2115_v19 = vand.u32 4294901760, %v3270_v55 }
  0x69   : > { %1752 = vmatpush1.msra.mxu1 %v3141_v20  ;;  %1785 = vmatprep.mubr.f32.mxu1 %v2886_v1  ;;  %v2127_v22 = vand.u32 4294901760, %v3286_v12  ;;  %v2159_v45 = vand.u32 4294901760, %v2158_v41 }
  0x6a   : > { %1843 = vmatpush1.msra.mxu0 %v1541_v27  ;;  %1789 = vmatmul.mubr.f32.vlgmr.msra.gmra.mxu1 %v3164_v28  ;;  %v3308_v27 = vsub.f32 %v309_v5, %v3278_v11 }
  0x6b   : > { %1707 = vmatmul.mubr.f32.gmra.mxu0 %v3179_v35  ;;  %1847 = vmatprep.subr.mxu0 %v1547_v32  ;;  %v2128_v32 = vsub.f32 %v3286_v12, %v2127_v22 }
  0x6c   : > { %1932 = vmatprep.subr.mxu1 %v3058_v52  ;;  %1851 = vmatpush1.msra.mxu0 %v1553_v30  ;;  %v3313_v52 = vsub.f32 %v308_v6, %v3283_v8 }
  0x6d   : > { %1934 = vmatpush1.msra.mxu1 %v3084_v58  ;;  %1855 = vmatprep.subr.mxu0 %v1559_v34  ;;  %v3320_v58 = vsub.f32 %v305_v59, %v3292_v17  ;;  %v2123_v34 = vand.u32 4294901760, %v2122_v29  ;;  %v2129_v38 = vand.u32 4294901760, %v2128_v32 }
  0x6e   : > { %1936 = vmatprep.subr.mxu1 %v3091_v61  ;;  %1794 = vmatprep.mubr.f32.mxu1 %v2886_v1  ;;  %v2116_v61 = vsub.f32 %v3270_v55, %v2115_v19  ;;  %v2145_v30 = vand.u32 4294901760, %v3313_v52 }
  0x6f   : > { %1859 = vmatpush1.msra.mxu0 %v1565_v40  ;;  %1892 = vmatprep.mubr.f32.mxu0 %v2886_v1 }
  0x70   : > { %1938 = vmatpush1.msra.mxu1 %v3108_v4  ;;  %1894 = vmatmul.mubr.f32.vlgmr.msra.gmra.mxu0 %v3104_v3  ;;  %v2139_v4 = vand.u32 4294901760, %v3308_v27  ;;  %v2117_v33 = vand.u32 4294901760, %v2116_v61  ;;  %v2146_v36 = vsub.f32 %v3313_v52, %v2145_v30 }
  0x71   : > { %1798 = vmatmul.mubr.f32.gmra.mxu1 %v3203_v43  ;;  %1940 = vmatprep.subr.mxu1 %v3115_v7  ;;  %v2151_v7 = vand.u32 4294901760, %v3320_v58 }
  0x72   : > { %2019 = vmatprep.subr.mxu0 %v3247_v60  ;;  %1942 = vmatpush1.msra.mxu1 %v3122_v10  ;;  %v2134_v10 = vsub.f32 %v3298_v14, %v2133_v24  ;;  %v2147_v42 = vand.u32 4294901760, %v2146_v36 }
  0x73   : > { %2021 = vmatpush1.msra.mxu0 %v3251_v62  ;;  %1944 = vmatprep.subr.mxu1 %v3127_v13  ;;  %v2140_v13 = vsub.f32 %v3308_v27, %v2139_v4 }
  0x74   : > { %2023 = vmatprep.subr.mxu0 %v3257_v2  ;;  %1899 = vmatprep.mubr.f32.mxu0 %v2886_v1  ;;  %v2135_v39 = vand.u32 4294901760, %v2134_v10 }
  0x75   : > { %1946 = vmatpush1.msra.mxu1 %v3141_v20  ;;  %1979 = vmatprep.mubr.f32.mxu1 %v2886_v1  ;;  %v2152_v20 = vsub.f32 %v3320_v58, %v2151_v7  ;;  %v2141_v40 = vand.u32 4294901760, %v2140_v13 }
  0x76   : > { %2025 = vmatpush1.msra.mxu0 %v3267_v9  ;;  %1981 = vmatmul.mubr.f32.vlgmr.msra.gmra.mxu1 %v3104_v3 }
  0x77   : > { %1901 = vmatmul.mubr.f32.gmra.mxu0 %v3159_v26  ;;  %2027 = vmatprep.subr.mxu0 %v3278_v11  ;;  %v2153_v44 = vand.u32 4294901760, %v2152_v20 }
  0x78   : > { %2118 = vmatprep.subr.mxu1 %v2117_v33  ;;  %2029 = vmatpush1.msra.mxu0 %v3283_v8 }
  0x79   : > { %2124 = vmatpush1.msra.mxu1 %v2123_v34  ;;  %2031 = vmatprep.subr.mxu0 %v3292_v17 }
  0x7a   : > { %2130 = vmatprep.subr.mxu1 %v2129_v38  ;;  %1986 = vmatprep.mubr.f32.mxu1 %v2886_v1 }
  0x7b   : > { %2033 = vmatpush1.msra.mxu0 %v3305_v23  ;;  %2066 = vmatprep.mubr.f32.mxu0 %v2886_v1 }
  0x7c   : > { %2136 = vmatpush1.msra.mxu1 %v2135_v39  ;;  %2072 = vmatmul.mubr.f32.vlgmr.msra.gmra.mxu0 %v3207_v18 }
  0x7d   : > { %1988 = vmatmul.mubr.f32.gmra.mxu1 %v3159_v26  ;;  %2142 = vmatprep.subr.mxu1 %v2141_v40 }
  0x7e   : > { %2234 = vmatprep.subr.mxu0 %v3270_v55  ;;  %2148 = vmatpush1.msra.mxu1 %v2147_v42 }
  0x7f   : > { %2237 = vmatpush1.msra.mxu0 %v3276_v0  ;;  %2154 = vmatprep.subr.mxu1 %v2153_v44 }
  0x80   : > { %2240 = vmatprep.subr.mxu0 %v3286_v12  ;;  %2077 = vmatprep.mubr.f32.mxu0 %v2886_v1 }
  0x81   : > { %2160 = vmatpush1.msra.mxu1 %v2159_v45  ;;  %2193 = vmatprep.mubr.f32.mxu1 %v2886_v1 }
  0x82   : > { %2243 = vmatpush1.msra.mxu0 %v3298_v14  ;;  %2195 = vmatmul.mubr.f32.vlgmr.msra.gmra.mxu1 %v3104_v3 }
  0x83   : > { %2083 = vmatmul.mubr.f32.gmra.mxu0 %v3223_v51  ;;  %2246 = vmatprep.subr.mxu0 %v3308_v27 }
  0x84   : > { %2330 = vmatprep.subr.mxu1 %v3247_v60  ;;  %2249 = vmatpush1.msra.mxu0 %v3313_v52 }
  0x85   : > { %2332 = vmatpush1.msra.mxu1 %v3251_v62  ;;  %2252 = vmatprep.subr.mxu0 %v3320_v58 }
  0x86   : > { %2334 = vmatprep.subr.mxu1 %v3257_v2  ;;  %2200 = vmatprep.mubr.f32.mxu1 %v2886_v1 }
  0x87   : > { %2255 = vmatpush1.msra.mxu0 %v3334_v31  ;;  %2288 = vmatprep.mubr.f32.mxu0 %v2886_v1 }
  0x88   : > { %2336 = vmatpush1.msra.mxu1 %v3267_v9  ;;  %2291 = vmatmul.mubr.f32.vlgmr.msra.gmra.mxu0 %v3134_v16 }
  0x89   : > { %2202 = vmatmul.mubr.f32.gmra.mxu1 %v3159_v26  ;;  %2338 = vmatprep.subr.mxu1 %v3278_v11 }
  0x8a   : > { %2423 = vmatprep.subr.mxu0 %v2115_v19  ;;  %2340 = vmatpush1.msra.mxu1 %v3283_v8 }
  0x8b   : > { %2427 = vmatpush1.msra.mxu0 %v2121_v21  ;;  %2342 = vmatprep.subr.mxu1 %v3292_v17 }
  0x8c   : > { %2431 = vmatprep.subr.mxu0 %v2127_v22  ;;  %2296 = vmatprep.mubr.f32.mxu0 %v2886_v1 }
  0x8d   : > { %2344 = vmatpush1.msra.mxu1 %v3305_v23  ;;  %2377 = vmatprep.mubr.f32.mxu1 %v2886_v1 }
  0x8e   : > { %2435 = vmatpush1.msra.mxu0 %v2133_v24  ;;  %2381 = vmatmul.mubr.f32.vlgmr.msra.gmra.mxu1 %v3164_v28 }
  0x8f   : > { %2299 = vmatmul.mubr.f32.gmra.mxu0 %v3179_v35  ;;  %2439 = vmatprep.subr.mxu0 %v2139_v4 }
  0x90   : > { %2524 = vmatprep.subr.mxu1 %v3247_v60  ;;  %2443 = vmatpush1.msra.mxu0 %v2145_v30 }
  0x91   : > { %2526 = vmatpush1.msra.mxu1 %v3251_v62  ;;  %2447 = vmatprep.subr.mxu0 %v2151_v7 }
  0x92   : > { %2528 = vmatprep.subr.mxu1 %v3257_v2  ;;  %2386 = vmatprep.mubr.f32.mxu1 %v2886_v1 }
  0x93   : > { %2451 = vmatpush1.msra.mxu0 %v2157_v37  ;;  %2484 = vmatprep.mubr.f32.mxu0 %v2886_v1 }
  0x94   : > { %2530 = vmatpush1.msra.mxu1 %v3267_v9  ;;  %2486 = vmatmul.mubr.f32.vlgmr.msra.gmra.mxu0 %v3104_v3 }
  0x95   : > { %2390 = vmatmul.mubr.f32.gmra.mxu1 %v3203_v43  ;;  %2532 = vmatprep.subr.mxu1 %v3278_v11 }
  0x96   : > { %2534 = vmatpush1.msra.mxu1 %v3283_v8  ;;  %2491 = vmatprep.mubr.f32.mxu0 %v2886_v1 }
  0x97   : > { %2536 = vmatprep.subr.mxu1 %v3292_v17  ;;  %2571 = vmatprep.mubr.f32.mxu1 %v2886_v1 }
  0x98   : > { %2538 = vmatpush1.msra.mxu1 %v3305_v23  ;;  %2493 = vmatmul.mubr.f32.gmra.mxu0 %v3159_v26 }
  0x99   : > { %2573 = vmatmul.mubr.f32.vlgmr.msra.gmra.mxu1 %v3104_v3 }
  0x9a   : > { %2578 = vmatprep.mubr.f32.mxu1 %v2886_v1 }
  0x9d   : > { %2580 = vmatmul.mubr.f32.gmra.mxu1 %v3159_v26 }
  0xe7   : > { %v427_v16 = vpop.f32.mrf.mxu0 }
  0xe9   : > { %v429_v28 = vpop.f32.mrf.mxu0 }
  0xea   : > { %v520_v35 = vpop.f32.mrf.mxu1 }
  0xeb   : > { %v438_v43 = vpop.f32.mrf.mxu0  ;;  %v521_v37 = vadd.f32 %v520_v35, %v427_v16 }
  0xec   : > { %v522_v18 = vpop.f32.mrf.mxu1 }
  0xed   : > { %v3439_v46 = vpop.f32.mrf.mxu0  ;;  %v523_v36 = vadd.f32 %v522_v18, %v429_v28 }
  0xee   : > { %v527_v47 = vpop.f32.mrf.mxu1 }
  0xef   : > { %v604_v48 = vpop.f32.mrf.mxu0 }
  0xf0   : > { %v529_v49 = vpop.f32.mrf.mxu1  ;;  %v605_v20 = vadd.f32 %v604_v48, %v521_v37 }
  0xf1   : > { %v606_v50 = vpop.f32.mrf.mxu0 }
  0xf2   : > { %v688_v51 = vpop.f32.mrf.mxu1  ;;  %v607_v40 = vadd.f32 %v606_v50, %v523_v36 }
  0xf3   : > { %v689_v41 = vadd.f32 %v688_v51, %v605_v20 }
  0xf4   : > { %v612_v25 = vpop.f32.mrf.mxu0  ;;  %v690_v53 = vpop.f32.mrf.mxu1 }
  0xf5   : > { %v691_v45 = vadd.f32 %v690_v53, %v607_v40 }
  0xf6   : > { %v3441_v54 = vpop.f32.mrf.mxu0  ;;  %v3443_v3 = vpop.f32.mrf.mxu1 }
  0xf8   : > { %v775_v1 = vpop.f32.mrf.mxu0  ;;  %v3445_v26 = vpop.f32.mrf.mxu1 }
  0xfa   : > { %v777_v56 = vpop.f32.mrf.mxu0  ;;  %v856_v57 = vpop.f32.mrf.mxu1 }
  0xfc   : > { %v782_v60 = vpop.f32.mrf.mxu0  ;;  %v858_v62 = vpop.f32.mrf.mxu1 }
  0xfe   : > { %v3447_v63 = vpop.f32.mrf.mxu0  ;;  %v3449_v2 = vpop.f32.mrf.mxu1 }
 0x100   : > { %v3451_v5 = vpop.f32.mrf.mxu0  ;;  %v3453_v6 = vpop.f32.mrf.mxu1 }
 0x102   : > { %v3455_v9 = vpop.f32.mrf.mxu0  ;;  %v3457_v55 = vpop.f32.mrf.mxu1 }
 0x104   : > { %v3459_v59 = vpop.f32.mrf.mxu0  ;;  %v3461_v0 = vpop.f32.mrf.mxu1 }
 0x106   : > { %v3463_v11 = vpop.f32.mrf.mxu0  ;;  %v3465_v8 = vpop.f32.mrf.mxu1 }
 0x108   : > { %v3467_v12 = vpop.f32.mrf.mxu0  ;;  %v3469_v15 = vpop.f32.mrf.mxu1 }
 0x10a   : > { %v3471_v17 = vpop.f32.mrf.mxu0  ;;  %v3473_v14 = vpop.f32.mrf.mxu1 }
 0x10c   : > { %v3475_v19 = vpop.f32.mrf.mxu0  ;;  %v3477_v21 = vpop.f32.mrf.mxu1 }
 0x10e   : > { %v3479_v23 = vpop.f32.mrf.mxu0  ;;  %v3481_v27 = vpop.f32.mrf.mxu1 }
 0x110   : > { %v3483_v52 = vpop.f32.mrf.mxu0  ;;  %v3485_v22 = vpop.f32.mrf.mxu1 }
 0x111   : > { %3608 = vst [vmem:[#allocation5_spill] sm:$0xff] %v3485_v22 }
 0x112   : > { %v3487_v58 = vpop.f32.mrf.mxu0  ;;  %v3489_v61 = vpop.f32.mrf.mxu1 }
 0x113   : > { %3609 = vst [vmem:[#allocation6_spill] sm:$0xff] %v3487_v58  ;;  %3610 = vst [vmem:[#allocation7_spill] sm:$0xff] %v3489_v61  ;;  %v530_v61 = vadd.f32 %v529_v49, %v3439_v46 }
 0x114   : > { %v3491_v24 = vpop.f32.mrf.mxu0  ;;  %v3493_v29 = vpop.f32.mrf.mxu1 }
 0x115   : > { %3611 = vst [vmem:[#allocation8_spill] sm:$0xff] %v3491_v24  ;;  %3612 = vst [vmem:[#allocation9_spill] sm:$0xff] %v3493_v29  ;;  %v528_v29 = vadd.f32 %v527_v47, %v438_v43  ;;  %v778_v24 = vadd.f32 %v777_v56, %v691_v45  ;;  %v615_v48 = vadd.f32 %v3441_v54, %v530_v61 }
 0x116   : > { %v3495_v31 = vpop.f32.mrf.mxu0 }
 0x117   : > { %3613 = vst [vmem:[#allocation10_spill] sm:$0xff] %v3495_v31  ;;  %v776_v31 = vadd.f32 %v775_v1, %v689_v41  ;;  %v613_v58 = vadd.f32 %v612_v25, %v528_v29  ;;  %v859_v16 = vadd.f32 %v858_v62, %v778_v24  ;;  %v700_v43 = vadd.f32 %v3445_v26, %v615_v48 }
 0x118   : > { %v1481_v4 = vpop.f32.mrf.mxu0 }
 0x119   : > { %v3497_v32 = vpop.f32.mrf.mxu1  ;;  %v698_v50 = vadd.f32 %v3443_v3, %v613_v58  ;;  %v785_v49 = vadd.f32 %v3447_v63, %v700_v43 }
 0x11a   : > { %3614 = vst [vmem:[#allocation11_spill] sm:$0xff] %v3497_v32  ;;  %v1483_v7 = vpop.f32.mrf.mxu0 }
 0x11b   : > { %v3499_v30 = vpop.f32.mrf.mxu1  ;;  %v1484_v51 = vadd.f32 %v1483_v7, %v859_v16  ;;  %v783_v47 = vadd.f32 %v782_v60, %v698_v50  ;;  %v866_v3 = vadd.f32 %v3453_v6, %v785_v49 }
 0x11c   : > { %3615 = vst [vmem:[#allocation12_spill] sm:$0xff] %v3499_v30  ;;  %v857_v30 = vadd.f32 %v856_v57, %v776_v31 }
 0x11d   : > { %v864_v25 = vadd.f32 %v3449_v2, %v783_v47 }
 0x11e   : > { %v1604_v33 = vpop.f32.mrf.mxu1  ;;  %v1482_v35 = vadd.f32 %v1481_v4, %v857_v30 }
 0x11f   : > { %v1492_v10 = vpop.f32.mrf.mxu0 }
 0x120   : > { %v1606_v13 = vpop.f32.mrf.mxu1  ;;  %v1605_v53 = vadd.f32 %v1604_v33, %v1482_v35  ;;  %v1493_v58 = vadd.f32 %v1492_v10, %v864_v25  ;;  %v3618_v25 = vld [vmem:[#allocation5_spill] sm:$0xff] }
 0x121   : > { %v1494_v34 = vpop.f32.mrf.mxu0  ;;  %v1607_v56 = vadd.f32 %v1606_v13, %v1484_v51 }
 0x122   : > { %v1495_v29 = vadd.f32 %v1494_v34, %v866_v3 }
 0x124   : > { %v1700_v38 = vpop.f32.mrf.mxu0 }
 0x125   : > { %v1611_v39 = vpop.f32.mrf.mxu1  ;;  %v1701_v57 = vadd.f32 %v1700_v38, %v1605_v53  ;;  %v1042_v53 = vadd.f32 %v3465_v8, %v3459_v59  ;;  %v3616_v59 = vld [vmem:[#allocation6_spill] sm:$0xff] }
 0x126   : > { %v1702_v44 = vpop.f32.mrf.mxu0  ;;  %v1612_v31 = vadd.f32 %v1611_v39, %v1493_v58 }
 0x127   : > { %v1613_v42 = vpop.f32.mrf.mxu1  ;;  %v1703_v62 = vadd.f32 %v1702_v44, %v1607_v56 }
 0x128   : > { %v1614_v63 = vadd.f32 %v1613_v42, %v1495_v29 }
 0x12a   : > { %v1790_v32 = vpop.f32.mrf.mxu1 }
 0x12b   : > { %v1708_v22 = vpop.f32.mrf.mxu0  ;;  %v1791_v24 = vadd.f32 %v1790_v32, %v1701_v57  ;;  %v1044_v57 = vadd.f32 %v3469_v15, %v3463_v11  ;;  %v3620_v15 = vld [vmem:[#allocation9_spill] sm:$0xff] }
 0x12c   : > { %v1792_v18 = vpop.f32.mrf.mxu1  ;;  %v1709_v13 = vadd.f32 %v1708_v22, %v1612_v31 }
 0x12d   : > { %v1710_v28 = vpop.f32.mrf.mxu0  ;;  %v1793_v26 = vadd.f32 %v1792_v18, %v1703_v62  ;;  %v1037_v18 = vadd.f32 %v3461_v0, %v3455_v9  ;;  %v1129_v0 = vadd.f32 %v3479_v23, %v1044_v57  ;;  %v3622_v23 = vld [vmem:[#allocation11_spill] sm:$0xff] }
 0x12e   : > { %v1711_v10 = vadd.f32 %v1710_v28, %v1614_v63  ;;  %v1035_v28 = vadd.f32 %v3457_v55, %v3451_v5  ;;  %v1127_v5 = vadd.f32 %v3475_v19, %v1042_v53 }
 0x12f   : > { %v1121_v43 = vadd.f32 %v3471_v17, %v1037_v18  ;;  %v3617_v17 = vld [vmem:[#allocation7_spill] sm:$0xff]  ;;  %v1214_v62 = vadd.f32 %v3618_v25, %v1129_v0 }
 0x130   : > { %v1895_v1 = vpop.f32.mrf.mxu0  ;;  %v1119_v48 = vadd.f32 %v3467_v12, %v1035_v28  ;;  %v1212_v12 = vadd.f32 %v3481_v27, %v1127_v5 }
 0x131   : > { %v1799_v46 = vpop.f32.mrf.mxu1  ;;  %v1896_v60 = vadd.f32 %v1895_v1, %v1791_v24  ;;  %v1205_v9 = vadd.f32 %v3477_v21, %v1121_v43  ;;  %v3619_v24 = vld [vmem:[#allocation8_spill] sm:$0xff] }
 0x132   : > { %v1897_v61 = vpop.f32.mrf.mxu0  ;;  %v1800_v37 = vadd.f32 %v1799_v46, %v1709_v13  ;;  %v1203_v47 = vadd.f32 %v3473_v14, %v1119_v48  ;;  %v1297_v11 = vadd.f32 %v3619_v24, %v1212_v12 }
 0x133   : > { %v1801_v54 = vpop.f32.mrf.mxu1  ;;  %v1898_v30 = vadd.f32 %v1897_v61, %v1793_v26  ;;  %v1292_v8 = vadd.f32 %v3616_v59, %v1205_v9 }
 0x134   : > { %v1802_v34 = vadd.f32 %v1801_v54, %v1711_v10  ;;  %v1290_v55 = vadd.f32 %v3483_v52, %v1203_v47  ;;  %v3621_v52 = vld [vmem:[#allocation10_spill] sm:$0xff]  ;;  %v1378_v58 = vadd.f32 %v3622_v23, %v1297_v11 }
 0x135   : > { %v1373_v19 = vadd.f32 %v3620_v15, %v1292_v8  ;;  %v1299_v3 = vadd.f32 %v3621_v52, %v1214_v62 }
 0x136   : > { %v1982_v4 = vpop.f32.mrf.mxu1  ;;  %v1371_v46 = vadd.f32 %v3617_v17, %v1290_v55 }
 0x137   : > { %v1902_v7 = vpop.f32.mrf.mxu0  ;;  %v1983_v33 = vadd.f32 %v1982_v4, %v1896_v60  ;;  %v3623_v60 = vld [vmem:[#allocation12_spill] sm:$0xff] }
 0x138   : > { %v1984_v2 = vpop.f32.mrf.mxu1  ;;  %v1903_v38 = vadd.f32 %v1902_v7, %v1800_v37  ;;  %v1380_v29 = vadd.f32 %v3623_v60, %v1299_v3 }
 0x139   : > { %2586 = vst [vmem:[%s3511_s5] sm:$0xff] %v1983_v33  ;;  %v1904_v6 = vpop.f32.mrf.mxu0  ;;  %v1985_v32 = vadd.f32 %v1984_v2, %v1898_v30 }
 0x13a   : > { %v1905_v39 = vadd.f32 %v1904_v6, %v1802_v34 }
 0x13b   : > { %2587 = vst [vmem:[%s3511_s5 + $0x8] sm:$0xff] %v1985_v32 }
 0x13c   : > { %v2073_v36 = vpop.f32.mrf.mxu0 }
 0x13d   : > { %v1989_v20 = vpop.f32.mrf.mxu1  ;;  %v2074_v54 = vadd.f32 %v2073_v36, %v1371_v46 }
 0x13e   : > { %v1990_v40 = vadd.f32 %v1989_v20, %v1903_v38  ;;  %v2075_v41 = vpop.f32.mrf.mxu0 }
 0x13f   : > { %v1991_v22 = vpop.f32.mrf.mxu1  ;;  %v2076_v27 = vadd.f32 %v2075_v41, %v1373_v19 }
 0x140   : > { %2590 = vst [vmem:[%s3511_s5 + $0x20] sm:$0xff] %v1990_v40  ;;  %v1992_v42 = vadd.f32 %v1991_v22, %v1905_v39 }
 0x142   : > { %2591 = vst [vmem:[%s3511_s5 + $0x28] sm:$0xff] %v1992_v42  ;;  %v2196_v44 = vpop.f32.mrf.mxu1 }
 0x143   : > { %v2084_v45 = vpop.f32.mrf.mxu0  ;;  %v2197_v26 = vadd.f32 %v2196_v44, %v2074_v54 }
 0x144   : > { %v2198_v35 = vpop.f32.mrf.mxu1  ;;  %v2085_v31 = vadd.f32 %v2084_v45, %v1378_v58 }
 0x145   : > { %v2086_v16 = vpop.f32.mrf.mxu0  ;;  %v2199_v4 = vadd.f32 %v2198_v35, %v2076_v27 }
 0x146   : > { %v2087_v63 = vadd.f32 %v2086_v16, %v1380_v29 }
 0x148   : > { %v2292_v50 = vpop.f32.mrf.mxu0 }
 0x149   : > { %v2203_v51 = vpop.f32.mrf.mxu1  ;;  %v2293_v30 = vadd.f32 %v2292_v50, %v2197_v26 }
 0x14a   : > { %v2294_v56 = vpop.f32.mrf.mxu0  ;;  %v2204_v13 = vadd.f32 %v2203_v51, %v2085_v31 }
 0x14b   : > { %v2205_v1 = vpop.f32.mrf.mxu1  ;;  %v2295_v2 = vadd.f32 %v2294_v56, %v2199_v4 }
 0x14c   : > { %v2206_v37 = vadd.f32 %v2205_v1, %v2087_v63 }
 0x14e   : > { %v2382_v14 = vpop.f32.mrf.mxu1 }
 0x14f   : > { %v2300_v49 = vpop.f32.mrf.mxu0  ;;  %v2383_v6 = vadd.f32 %v2382_v14, %v2293_v30 }
 0x150   : > { %v2384_v61 = vpop.f32.mrf.mxu1  ;;  %v2301_v34 = vadd.f32 %v2300_v49, %v2204_v13 }
 0x151   : > { %v2302_v21 = vpop.f32.mrf.mxu0  ;;  %v2385_v38 = vadd.f32 %v2384_v61, %v2295_v2 }
 0x152   : > { %v2303_v40 = vadd.f32 %v2302_v21, %v2206_v37 }
 0x154   : > { %v2487_v7 = vpop.f32.mrf.mxu0 }
 0x155   : > { %v2391_v33 = vpop.f32.mrf.mxu1  ;;  %v2488_v36 = vadd.f32 %v2487_v7, %v2383_v6 }
 0x156   : > { %v2489_v32 = vpop.f32.mrf.mxu0  ;;  %v2392_v22 = vadd.f32 %v2391_v33, %v2301_v34 }
 0x157   : > { %v2393_v10 = vpop.f32.mrf.mxu1  ;;  %v2490_v41 = vadd.f32 %v2489_v32, %v2385_v38 }
 0x158   : > { %v2494_v20 = vpop.f32.mrf.mxu0  ;;  %v2394_v16 = vadd.f32 %v2393_v10, %v2303_v40 }
 0x159   : > { %v2574_v39 = vpop.f32.mrf.mxu1  ;;  %v2495_v35 = vadd.f32 %v2494_v20, %v2392_v22 }
 0x15a   : > { %v2575_v42 = vadd.f32 %v2574_v39, %v2488_v36  ;;  %v2496_v44 = vpop.f32.mrf.mxu0 }
 0x15b   : > { %v2576_v45 = vpop.f32.mrf.mxu1  ;;  %v2497_v48 = vadd.f32 %v2496_v44, %v2394_v16 }
 0x15c   : > { %2588 = vst [vmem:[%s3511_s5 + $0x10] sm:$0xff] %v2575_v42  ;;  %v2577_v28 = vadd.f32 %v2576_v45, %v2490_v41 }
 0x15d   : > { %v2581_v18 = vpop.f32.mrf.mxu1 }
 0x15e   : > { %2589 = vst [vmem:[%s3511_s5 + $0x18] sm:$0xff] %v2577_v28  ;;  %v2582_v50 = vadd.f32 %v2581_v18, %v2495_v35 }
 0x15f   : > { %v2583_v51 = vpop.f32.mrf.mxu1 }
 0x160   : > { %2592 = vst [vmem:[%s3511_s5 + $0x30] sm:$0xff] %v2582_v50  ;;  %v2584_v53 = vadd.f32 %v2583_v51, %v2497_v48 }
 0x162   : > { %2593 = vst [vmem:[%s3511_s5 + $0x38] sm:$0xff] %v2584_v53 }
 0x163   : > { %2821 = shalt.err (!%p2818_p5)
}
 0x164   : > { %s2822_s21 = scalar_lea.hbm %s3548_s10, 1024  ;;  %s2826_s26 = scalar_lea.hbm %s3605_s4, 2048 }
 0x165   : > { %p2823_p6 = scmp.ne.s32.totalorder %s3548_s10, %s2822_s21  ;;  %p2827_p10 = scmp.lt.s32.totalorder %s3548_s10, %s3605_s4 }
 0x166   : > { %p2828_p11 = scmp.lt.s32.totalorder %s2826_s26, %s2822_s21 }
 0x167   : > { %p2824_p7 = pnand %p2823_p6, %p2955_p4 }
 0x168   : > { %p2829_p12 = por %p2828_p11, %p2827_p10 }
 0x169   : > { %p2825_p9 = pneg %p2824_p7 }
 0x16b   : > { %p2830_p13 = pnand %p2829_p12, %p2825_p9 }
 0x16d   : > { %2833 = shalt.err (!%p2830_p13)
}
 0x16e   : > { %s2888_s5 = smov 512   ;;  %s2889_s6 = smov 32  }
 0x16f   : > { %2750 = dma.vmem_to_hbm [thread:$0]  (%p2955_p4), %s3550_s7, 1024, %s3548_s10, %s3556_s18, %s2888_s5, %s2888_s5, %s2889_s6  }
 0x170 PF: > { %p2756_p0 = scmp.ge.s32.totalorder %s2884_s20, 2  ;;  %s2625_s8 = sand.u32 1, %s2864_s15  }
 0x171   : > { %s2626_s9 = scalar_lea.sflag [#allocation3], %s2625_s8 }
 0x172   : > { %p2753_p1 = pnand %p2756_p0, %p2962_p8 }
 0x174   : > { %p2754_p2 = pneg %p2753_p1 }
 0x176   : > { %2859 = dma.done.wait (%p2754_p2), %s2626_s9, 1024  }
 0x177   : > { %2861 = vsyncadd (%p2754_p2), %s2626_s9, 4294966272  ;;  %s17_s20 = sadd.s32 1, %s2884_s20   ;;  %s3624_s15 = smov %s2868_s16 }
 0x178   : > { %p14_p3 = scmp.ge.s32.totalorder %s17_s20, 4   ;;  %s3625_s16 = smov %s2872_s17 }
 0x179   : > { %s3626_s17 = smov %s2968_s28  ;;  %s3627_s18 = smov %s2880_s19 }
 0x17a   : > { %s3628_s19 = smov %s3630_s23  ;;  %16 = sbr.rel (!%p14_p3) target bundleno = 4 (0x4), region = 80 }
 0x17f   :  { %2631 = vsyncpa [#allocation3], 1 }
 0x180   :  { %2633 = vsyncpa [#allocation3 + $0x1], 1 }

</bundles_post_ra>
